<compile_context>
chip_gen: v6e
topology: v6e:2x2x1
jax: 0.10.0
libtpu: 0.0.40
codegen_flags: <defaults>
</compile_context>

<pallas_src>
import functools

import jax
import jax.numpy as jnp
from jax.experimental import pallas as pl
from jax.experimental.pallas import tpu as pltpu

IN_FEATURES = 784   # 98 * 8 — sublane-divisible, so no K padding needed
OUT_FEATURES = 10
N_PAD = 128         # lane-dense output width (real logits live in columns 0..9)


def _round_up(n, m):
    return (n + m - 1) // m * m


def linear_kernel(x_ref, wt_ref, b_ref, o_ref):
    # x_ref : (TB, 784)    VMEM (f32 or bf16)   — one batch tile
    # wt_ref: (784, 128)   VMEM (same dtype)    — resident across grid steps
    # b_ref : (1, 128)     VMEM f32             — resident across grid steps
    # o_ref : (TB, 128)    VMEM f32             — lane-dense, unmasked stores
    acc = jnp.dot(x_ref[...], wt_ref[...], preferred_element_type=jnp.float32)
    o_ref[...] = (acc + b_ref[...]).astype(o_ref.dtype)


def prepare_params(weight, bias, compute_dtype=jnp.float32):
    """One-time layout prep (hoisted out of the per-forward path).

    weight: (10, 784) PyTorch-style -> W^T zero-padded along N to (784, 128)
    bias  : (10,)                   -> zero-padded (1, 128), kept f32
    """
    wt = jnp.zeros((IN_FEATURES, N_PAD), dtype=compute_dtype)
    wt = wt.at[:, :OUT_FEATURES].set(weight.T.astype(compute_dtype))
    b = jnp.zeros((1, N_PAD), dtype=jnp.float32)
    b = b.at[0, :OUT_FEATURES].set(bias.astype(jnp.float32))
    return wt, b


@functools.partial(jax.jit, static_argnames=("block_b",))
def mnist_logistic_forward(x, wt_prepped, b_prepped, *, block_b=512):
    """y = x @ weight.T + bias, matching nn.Linear(784, 10).forward (f32 logits)."""
    B = x.shape[0]
    compute_dtype = wt_prepped.dtype

    tb = min(block_b, _round_up(B, 8))   # batch tile, multiple of 8
    b_pad = _round_up(B, tb)
    grid = (b_pad // tb,)

    # Zero-copy fast path: only cast / pad when actually required (trace-time check).
    x_p = x if x.dtype == compute_dtype else x.astype(compute_dtype)
    if b_pad != B:
        x_p = jnp.pad(x_p, ((0, b_pad - B), (0, 0)))

    itemsize = jnp.dtype(compute_dtype).itemsize
    cost = pl.CostEstimate(
        flops=2 * b_pad * IN_FEATURES * N_PAD,
        transcendentals=0,
        bytes_accessed=(b_pad * IN_FEATURES + IN_FEATURES * N_PAD) * itemsize
        + (b_pad * N_PAD + N_PAD) * 4,
    )

    out = pl.pallas_call(
        linear_kernel,
        out_shape=jax.ShapeDtypeStruct((b_pad, N_PAD), jnp.float32),
        grid_spec=pltpu.PrefetchScalarGridSpec(
            num_scalar_prefetch=0,
            grid=grid,
            in_specs=[
                pl.BlockSpec((tb, IN_FEATURES), lambda i: (i, 0)),
                pl.BlockSpec((IN_FEATURES, N_PAD), lambda i: (0, 0)),  # weight resident
                pl.BlockSpec((1, N_PAD), lambda i: (0, 0)),            # bias resident
            ],
            out_specs=pl.BlockSpec((tb, N_PAD), lambda i: (i, 0)),
        ),
        compiler_params=pltpu.CompilerParams(
            dimension_semantics=("parallel",),  # batch tiles independent (2 TCs on v7x)
        ),
        cost_estimate=cost,
    )(x_p, wt_prepped, b_prepped)

    # Slice back to the real batch and the 10 real logits.
    return out[:B, :OUT_FEATURES]


if __name__ == "__main__":
    key = jax.random.PRNGKey(0)
    k_x, k_w, k_b, k_x2 = jax.random.split(key, 4)

    bs = 64  # as in the reference script
    x = jax.random.normal(k_x, (bs, IN_FEATURES), dtype=jnp.float32)

    # Deterministic init mirroring nn.Linear default: U(-1/sqrt(in), 1/sqrt(in))
    bound = 1.0 / (IN_FEATURES ** 0.5)
    weight = jax.random.uniform(
        k_w, (OUT_FEATURES, IN_FEATURES), dtype=jnp.float32,
        minval=-bound, maxval=bound)
    bias = jax.random.uniform(
        k_b, (OUT_FEATURES,), dtype=jnp.float32,
        minval=-bound, maxval=bound)

    ref = x @ weight.T + bias

    # --- f32 path (exact semantics of the original module) ---
    wt_f32, b_f32 = prepare_params(weight, bias, compute_dtype=jnp.float32)
    out_f32 = mnist_logistic_forward(x, wt_f32, b_f32)
    jax.block_until_ready(out_f32)
    assert out_f32.shape == (bs, OUT_FEATURES)
    assert jnp.allclose(out_f32, ref, atol=1e-4, rtol=1e-4)

    # --- bf16 input path (halves HBM traffic; f32 MXU accumulate) ---
    wt_bf16, b_bf16 = prepare_params(weight, bias, compute_dtype=jnp.bfloat16)
    out_bf16 = mnist_logistic_forward(x, wt_bf16, b_bf16)
    jax.block_until_ready(out_bf16)
    assert out_bf16.shape == (bs, OUT_FEATURES)
    assert jnp.allclose(out_bf16, ref, atol=3e-2, rtol=3e-2)

    # --- multi-tile grid path: batch not a multiple of the tile (exercises padding) ---
    bs2 = 200
    x2 = jax.random.normal(k_x2, (bs2, IN_FEATURES), dtype=jnp.float32)
    out2 = mnist_logistic_forward(x2, wt_f32, b_f32, block_b=128)  # grid=(2,)
    jax.block_until_ready(out2)
    ref2 = x2 @ weight.T + bias
    assert out2.shape == (bs2, OUT_FEATURES)
    assert jnp.allclose(out2, ref2, atol=1e-4, rtol=1e-4)

    print("KERNEL_OK")
</pallas_src>

<mosaic_0001>
module attributes {stable_mosaic.version = 11 : i64} {
  func.func @linear_kernel(%arg0: i32, %arg1: memref<64x784xf32, #tpu.memory_space<vmem>>, %arg2: memref<784x128xf32, #tpu.memory_space<vmem>>, %arg3: memref<1x128xf32, #tpu.memory_space<vmem>>, %arg4: memref<64x128xf32, #tpu.memory_space<vmem>>) attributes {dimension_semantics = [#tpu.dimension_semantics<parallel>], iteration_bounds = array<i64: 1>, scalar_prefetch = 0 : i64, scratch_operands = 0 : i64, tpu.core_type = #tpu.core_type<tc>, window_params = [{transform_indices = @transform_0, window_bounds = array<i64: 64, 784>}, {pipeline_mode = #tpu.pipeline_mode<synchronous>, transform_indices = @transform_1, window_bounds = array<i64: 784, 128>}, {pipeline_mode = #tpu.pipeline_mode<synchronous>, transform_indices = @transform_2, window_bounds = array<i64: 1, 128>}, {transform_indices = @transform_3, window_bounds = array<i64: 64, 128>}]} {
    %c0 = arith.constant 0 : index
    %c0_0 = arith.constant 0 : index
    %0 = vector.load %arg1[%c0, %c0_0] : memref<64x784xf32, #tpu.memory_space<vmem>>, vector<64x784xf32>
    %c0_1 = arith.constant 0 : index
    %c0_2 = arith.constant 0 : index
    %1 = vector.load %arg2[%c0_1, %c0_2] : memref<784x128xf32, #tpu.memory_space<vmem>>, vector<784x128xf32>
    %cst = arith.constant dense<0.000000e+00> : vector<64x128xf32>
    %2 = tpu.matmul %0, %1, %cst {dimension_numbers = #tpu.dot_dimension_numbers<[1], [0], [0], [1], [0, 0, 1, 1], [], []>} : vector<64x784xf32>, vector<784x128xf32>, vector<64x128xf32> -> vector<64x128xf32>
    %c0_3 = arith.constant 0 : index
    %c0_4 = arith.constant 0 : index
    %3 = vector.load %arg3[%c0_3, %c0_4] : memref<1x128xf32, #tpu.memory_space<vmem>>, vector<1x128xf32>
    %4 = vector.broadcast %3 : vector<1x128xf32> to vector<64x128xf32>
    %5 = arith.addf %2, %4 : vector<64x128xf32>
    %c0_5 = arith.constant 0 : index
    %c0_6 = arith.constant 0 : index
    %6 = vector.load %arg4[%c0_5, %c0_6] : memref<64x128xf32, #tpu.memory_space<vmem>>, vector<64x128xf32>
    tpu.vector_store %arg4[%c0_5, %c0_6], %5 {strides = array<i32>} : memref<64x128xf32, #tpu.memory_space<vmem>>, vector<64x128xf32>,
    return
  }
  func.func @transform_0(%arg0: i32) -> (i32, i32) {
    %c0_i32 = arith.constant 0 : i32
    %c0_i32_0 = arith.constant 0 : i32
    return %arg0, %c0_i32 : i32, i32
  }
  func.func @transform_1(%arg0: i32) -> (i32, i32) {
    %c0_i32 = arith.constant 0 : i32
    %c0_i32_0 = arith.constant 0 : i32
    %c0_i32_1 = arith.constant 0 : i32
    return %c0_i32, %c0_i32_0 : i32, i32
  }
  func.func @transform_2(%arg0: i32) -> (i32, i32) {
    %c0_i32 = arith.constant 0 : i32
    %c0_i32_0 = arith.constant 0 : i32
    %c0_i32_1 = arith.constant 0 : i32
    return %c0_i32, %c0_i32_0 : i32, i32
  }
  func.func @transform_3(%arg0: i32) -> (i32, i32) {
    %c0_i32 = arith.constant 0 : i32
    %c0_i32_0 = arith.constant 0 : i32
    return %arg0, %c0_i32 : i32, i32
  }
}

</mosaic_0001>

<bundles_post_ra>
// kernel: mnist_logistic_forward.1
= control target key start
LH: loop header
LB: loop body
LE: loop exit
PB: predicated region body
PF: predicated region fallthrough
CT: control target
= control target key end

     0   :  { %8 = vsyncpa [#allocation3], 0  ;;  %s1020_s0 = inlined_call_operand.hbm [shape: f32[64,784], index: 0, kind: input, shape index: {}]   ;;  %s1021_s1 = inlined_call_operand.hbm [shape: f32[784,128], index: 1, kind: input, shape index: {}]   ;;  %s1022_s2 = inlined_call_operand.vmem [shape: f32[1,128], index: 2, kind: input, shape index: {}]   ;;  %s1023_s3 = inlined_call_operand.vmem [shape: f32[64,128], index: 3, kind: output, shape index: {}]  }
   0x1   :  { %9 = vsyncpa [#allocation5], 0  ;;  %s947_s12 = smov [#allocation2]  }
   0x2   :  { %s15_s13 = sshll.u32 %s947_s12, 4  ;;  %s16_s13 = int_to_ptr.vmem [resolvable:$true] %s15_s13 }
   0x3   :  { %s911_s14 = scalar_lea.vmem %s16_s13, 7168  ;;  %p916_p1 = scmp.lt.s32.totalorder %s16_s13, %s16_s13 }
   0x4   :  { %p912_p0 = scmp.ne.s32.totalorder %s16_s13, %s911_s14  ;;  %p917_p2 = scmp.lt.s32.totalorder %s911_s14, %s911_s14 }
   0x6   :  { %p918_p3 = por %p917_p2, %p916_p1 }
   0x8   :  { %p919_p4 = pnand %p918_p3, %p912_p0 }
   0xa   :  { %922 = shalt.err (!%p919_p4)
}
   0xb   :  { %s948_s15 = smov 896   ;;  %s949_s16 = smov 56  }
   0xc   :  { %21 = dma.hbm_to_vmem [thread:$0]  %s1020_s0, 7168, %s16_s13, [#allocation3], %s948_s15, %s948_s15, %s949_s16  }
   0xd   :  { %s950_s19 = smov [#allocation4]  }
   0xe   :  { %s27_s20 = sshll.u32 %s950_s19, 4  ;;  %s28_s20 = int_to_ptr.vmem [resolvable:$true] %s27_s20 }
   0xf   :  { %s931_s21 = scalar_lea.vmem %s28_s20, 12544  ;;  %p936_p6 = scmp.lt.s32.totalorder %s28_s20, %s28_s20 }
  0x10   :  { %p932_p5 = scmp.ne.s32.totalorder %s28_s20, %s931_s21  ;;  %p937_p7 = scmp.lt.s32.totalorder %s931_s21, %s931_s21 }
  0x12   :  { %p938_p8 = por %p937_p7, %p936_p6 }
  0x14   :  { %p939_p9 = pnand %p938_p8, %p932_p5 }
  0x16   :  { %942 = shalt.err (!%p939_p9)
}
  0x17   :  { %s951_s22 = smov 128   ;;  %s952_s23 = smov 8  }
  0x18   :  { %33 = dma.hbm_to_vmem [thread:$0]  %s1021_s1, 12544, %s28_s20, [#allocation5], %s951_s22, %s951_s22, %s952_s23  }
  0x19   :  { %943 = dma.done.wait [#allocation3], 7168  }
  0x1a   :  { %944 = vsyncadd [#allocation3], 4294960128 }
  0x1b   :  { %945 = dma.done.wait [#allocation5], 12544  }
  0x1c   :  { %946 = vsyncadd [#allocation5], 4294954752  ;;  %v129_v0 = vld [vmem:[#allocation4 + $0xf8] sm:$0xff]  ;;  %v128_v4 = vld [vmem:[#allocation4 + $0xf0] sm:$0xff]  ;;  %vm203_vm0 = vcmask 130048  }
  0x1d   :  { %v161_v1 = vld [vmem:[#allocation4 + $0x1f8] sm:$0xff]  ;;  %671 = vmatprep.subr.mxu0 %v129_v0  ;;  %v160_v5 = vld [vmem:[#allocation4 + $0x1f0] sm:$0xff]  ;;  %v127_v8 = vld [vmem:[#allocation4 + $0xe8] sm:$0xff] }
  0x1e   :  { %v113_v2 = vld [vmem:[#allocation4 + $0x78] sm:$0xff]  ;;  %727 = vmatprep.subr.mxu1 %v161_v1  ;;  %v112_v6 = vld [vmem:[#allocation4 + $0x70] sm:$0xff]  ;;  %v159_v9 = vld [vmem:[#allocation4 + $0x1e8] sm:$0xff] }
  0x1f   :  { %v145_v3 = vld [vmem:[#allocation4 + $0x178] sm:$0xff]  ;;  %672 = vmatpush3.msra.mxu0 %v113_v2  ;;  %v144_v7 = vld [vmem:[#allocation4 + $0x170] sm:$0xff]  ;;  %v111_v10 = vld [vmem:[#allocation4 + $0x68] sm:$0xff] }
  0x20   :  { %728 = vmatpush3.msra.mxu1 %v145_v3  ;;  %673 = vmatprep.subr.mxu0 %v128_v4  ;;  %v143_v11 = vld [vmem:[#allocation4 + $0x168] sm:$0xff]  ;;  %v126_v12 = vld [vmem:[#allocation4 + $0xe0] sm:$0xff]  ;;  %v125_v16 = vld [vmem:[#allocation4 + $0xd8] sm:$0xff] }
  0x21   :  { %729 = vmatprep.subr.mxu1 %v160_v5  ;;  %674 = vmatpush3.msra.mxu0 %v112_v6  ;;  %v158_v13 = vld [vmem:[#allocation4 + $0x1e0] sm:$0xff]  ;;  %v157_v17 = vld [vmem:[#allocation4 + $0x1d8] sm:$0xff]  ;;  %v124_v20 = vld [vmem:[#allocation4 + $0xd0] sm:$0xff] }
  0x22   :  { %730 = vmatpush3.msra.mxu1 %v144_v7  ;;  %675 = vmatprep.subr.mxu0 %v127_v8  ;;  %v110_v14 = vld [vmem:[#allocation4 + $0x60] sm:$0xff]  ;;  %v109_v18 = vld [vmem:[#allocation4 + $0x58] sm:$0xff]  ;;  %v156_v21 = vld [vmem:[#allocation4 + $0x1d0] sm:$0xff] }
  0x23   :  { %731 = vmatprep.subr.mxu1 %v159_v9  ;;  %v142_v15 = vld [vmem:[#allocation4 + $0x160] sm:$0xff]  ;;  %676 = vmatpush3.msra.mxu0 %v111_v10  ;;  %v141_v19 = vld [vmem:[#allocation4 + $0x158] sm:$0xff]  ;;  %v108_v22 = vld [vmem:[#allocation4 + $0x50] sm:$0xff] }
  0x24   :  { %732 = vmatpush3.msra.mxu1 %v143_v11  ;;  %677 = vmatprep.subr.mxu0 %v126_v12  ;;  %v140_v23 = vld [vmem:[#allocation4 + $0x150] sm:$0xff]  ;;  %v123_v24 = vld [vmem:[#allocation4 + $0xc8] sm:$0xff]  ;;  %v122_v28 = vld [vmem:[#allocation4 + $0xc0] sm:$0xff] }
  0x25   :  { %733 = vmatprep.subr.mxu1 %v158_v13  ;;  %678 = vmatpush3.msra.mxu0 %v110_v14  ;;  %v155_v25 = vld [vmem:[#allocation4 + $0x1c8] sm:$0xff]  ;;  %v154_v29 = vld [vmem:[#allocation4 + $0x1c0] sm:$0xff]  ;;  %v121_v32 = vld [vmem:[#allocation4 + $0xb8] sm:$0xff] }
  0x26   :  { %734 = vmatpush3.msra.mxu1 %v142_v15  ;;  %679 = vmatprep.subr.mxu0 %v125_v16  ;;  %v107_v26 = vld [vmem:[#allocation4 + $0x48] sm:$0xff]  ;;  %v106_v30 = vld [vmem:[#allocation4 + $0x40] sm:$0xff]  ;;  %v153_v33 = vld [vmem:[#allocation4 + $0x1b8] sm:$0xff] }
  0x27   :  { %735 = vmatprep.subr.mxu1 %v157_v17  ;;  %680 = vmatpush3.msra.mxu0 %v109_v18  ;;  %v139_v27 = vld [vmem:[#allocation4 + $0x148] sm:$0xff]  ;;  %v138_v31 = vld [vmem:[#allocation4 + $0x140] sm:$0xff]  ;;  %v105_v34 = vld [vmem:[#allocation4 + $0x38] sm:$0xff] }
  0x28   :  { %736 = vmatpush3.msra.mxu1 %v141_v19  ;;  %681 = vmatprep.subr.mxu0 %v124_v20  ;;  %v137_v35 = vld [vmem:[#allocation4 + $0x138] sm:$0xff]  ;;  %v120_v36 = vld [vmem:[#allocation4 + $0xb0] sm:$0xff]  ;;  %v119_v40 = vld [vmem:[#allocation4 + $0xa8] sm:$0xff] }
  0x29   :  { %737 = vmatprep.subr.mxu1 %v156_v21  ;;  %682 = vmatpush3.msra.mxu0 %v108_v22  ;;  %v152_v37 = vld [vmem:[#allocation4 + $0x1b0] sm:$0xff]  ;;  %v151_v41 = vld [vmem:[#allocation4 + $0x1a8] sm:$0xff]  ;;  %v118_v44 = vld [vmem:[#allocation4 + $0xa0] sm:$0xff] }
  0x2a   :  { %738 = vmatpush3.msra.mxu1 %v140_v23  ;;  %683 = vmatprep.subr.mxu0 %v123_v24  ;;  %v104_v38 = vld [vmem:[#allocation4 + $0x30] sm:$0xff]  ;;  %v103_v42 = vld [vmem:[#allocation4 + $0x28] sm:$0xff]  ;;  %v150_v45 = vld [vmem:[#allocation4 + $0x1a0] sm:$0xff] }
  0x2b   :  { %739 = vmatprep.subr.mxu1 %v155_v25  ;;  %684 = vmatpush3.msra.mxu0 %v107_v26  ;;  %v136_v39 = vld [vmem:[#allocation4 + $0x130] sm:$0xff]  ;;  %v135_v43 = vld [vmem:[#allocation4 + $0x128] sm:$0xff]  ;;  %v102_v46 = vld [vmem:[#allocation4 + $0x20] sm:$0xff] }
  0x2c   :  { %740 = vmatpush3.msra.mxu1 %v139_v27  ;;  %685 = vmatprep.subr.mxu0 %v122_v28  ;;  %v134_v47 = vld [vmem:[#allocation4 + $0x120] sm:$0xff]  ;;  %v117_v48 = vld [vmem:[#allocation4 + $0x98] sm:$0xff]  ;;  %v116_v52 = vld [vmem:[#allocation4 + $0x90] sm:$0xff] }
  0x2d   :  { %741 = vmatprep.subr.mxu1 %v154_v29  ;;  %686 = vmatpush3.msra.mxu0 %v106_v30  ;;  %v149_v49 = vld [vmem:[#allocation4 + $0x198] sm:$0xff]  ;;  %v148_v53 = vld [vmem:[#allocation4 + $0x190] sm:$0xff]  ;;  %v115_v56 = vld [vmem:[#allocation4 + $0x88] sm:$0xff] }
  0x2e   :  { %742 = vmatpush3.msra.mxu1 %v138_v31  ;;  %687 = vmatprep.subr.mxu0 %v121_v32  ;;  %v101_v50 = vld [vmem:[#allocation4 + $0x18] sm:$0xff]  ;;  %v100_v54 = vld [vmem:[#allocation4 + $0x10] sm:$0xff]  ;;  %v147_v57 = vld [vmem:[#allocation4 + $0x188] sm:$0xff] }
  0x2f   :  { %743 = vmatprep.subr.mxu1 %v153_v33  ;;  %688 = vmatpush3.msra.mxu0 %v105_v34  ;;  %v133_v51 = vld [vmem:[#allocation4 + $0x118] sm:$0xff]  ;;  %v132_v55 = vld [vmem:[#allocation4 + $0x110] sm:$0xff]  ;;  %v99_v58 = vld [vmem:[#allocation4 + $0x8] sm:$0xff] }
  0x30   :  { %744 = vmatpush3.msra.mxu1 %v137_v35  ;;  %689 = vmatprep.subr.mxu0 %v120_v36  ;;  %v131_v59 = vld [vmem:[#allocation4 + $0x108] sm:$0xff]  ;;  %v114_v60 = vld [vmem:[#allocation4 + $0x80] sm:$0xff]  ;;  %v45_v1 = vld [vmem:[#allocation2 + $0x18] sm:$0xff] }
  0x31   :  { %745 = vmatprep.subr.mxu1 %v152_v37  ;;  %690 = vmatpush3.msra.mxu0 %v104_v38  ;;  %v146_v61 = vld [vmem:[#allocation4 + $0x180] sm:$0xff]  ;;  %v43_v63 = vld [vmem:[#allocation2 + $0x8] sm:$0xff]  ;;  %v44_v3 = vld [vmem:[#allocation2 + $0x10] sm:$0xff] }
  0x32   :  { %746 = vmatpush3.msra.mxu1 %v136_v39  ;;  %691 = vmatprep.subr.mxu0 %v119_v40  ;;  %v98_v62 = vld [vmem:[#allocation4] sm:$0xff]  ;;  %v193_v4 = vld [vmem:[#allocation4 + $0x2f8] sm:$0xff]  ;;  %v192_v6 = vld [vmem:[#allocation4 + $0x2f0] sm:$0xff] }
  0x33   :  { %747 = vmatprep.subr.mxu1 %v151_v41  ;;  %692 = vmatpush3.msra.mxu0 %v103_v42  ;;  %v130_v0 = vld [vmem:[#allocation4 + $0x100] sm:$0xff]  ;;  %v177_v5 = vld [vmem:[#allocation4 + $0x278] sm:$0xff]  ;;  %v52_v8 = vld [vmem:[#allocation2 + $0x50] sm:$0xff] }
  0x34   :  { %748 = vmatpush3.msra.mxu1 %v135_v43  ;;  %693 = vmatprep.subr.mxu0 %v118_v44  ;;  %v42_v2 = vld [vmem:[#allocation2] sm:$0xff]  ;;  %v176_v9 = vld [vmem:[#allocation4 + $0x270] sm:$0xff]  ;;  %v49_v10 = vld [vmem:[#allocation2 + $0x38] sm:$0xff] }
  0x35   :  { %749 = vmatprep.subr.mxu1 %v150_v45  ;;  %694 = vmatpush3.msra.mxu0 %v102_v46  ;;  %v50_v7 = vld [vmem:[#allocation2 + $0x40] sm:$0xff]  ;;  %v51_v11 = vld [vmem:[#allocation2 + $0x48] sm:$0xff]  ;;  %v57_v15 = vld [vmem:[#allocation2 + $0x78] sm:$0xff] }
  0x36   :  { %750 = vmatpush3.msra.mxu1 %v134_v47  ;;  %695 = vmatprep.subr.mxu0 %v117_v48  ;;  %v191_v12 = vld [vmem:[#allocation4 + $0x2e8] sm:$0xff]  ;;  %v190_v14 = vld [vmem:[#allocation4 + $0x2e0] sm:$0xff]  ;;  %v56_v18 = vld [vmem:[#allocation2 + $0x70] sm:$0xff] }
  0x37   :  { %751 = vmatprep.subr.mxu1 %v149_v49  ;;  %696 = vmatpush3.msra.mxu0 %v101_v50  ;;  %v175_v13 = vld [vmem:[#allocation4 + $0x268] sm:$0xff]  ;;  %v174_v17 = vld [vmem:[#allocation4 + $0x260] sm:$0xff]  ;;  %v189_v20 = vld [vmem:[#allocation4 + $0x2d8] sm:$0xff] }
  0x38   :  { %752 = vmatpush3.msra.mxu1 %v133_v51  ;;  %697 = vmatprep.subr.mxu0 %v116_v52  ;;  %v59_v16 = vld [vmem:[#allocation2 + $0x88] sm:$0xff]  ;;  %v58_v19 = vld [vmem:[#allocation2 + $0x80] sm:$0xff]  ;;  %v173_v21 = vld [vmem:[#allocation4 + $0x258] sm:$0xff] }
  0x39   :  { %753 = vmatprep.subr.mxu1 %v148_v53  ;;  %698 = vmatpush3.msra.mxu0 %v100_v54  ;;  %v188_v22 = vld [vmem:[#allocation4 + $0x2d0] sm:$0xff]  ;;  %v66_v24 = vld [vmem:[#allocation2 + $0xc0] sm:$0xff]  ;;  %v63_v26 = vld [vmem:[#allocation2 + $0xa8] sm:$0xff] }
  0x3a   :  { %754 = vmatpush3.msra.mxu1 %v132_v55  ;;  %699 = vmatprep.subr.mxu0 %v115_v56  ;;  %v64_v23 = vld [vmem:[#allocation2 + $0xb0] sm:$0xff]  ;;  %v65_v27 = vld [vmem:[#allocation2 + $0xb8] sm:$0xff]  ;;  %v187_v28 = vld [vmem:[#allocation4 + $0x2c8] sm:$0xff] }
  0x3b   :  { %755 = vmatprep.subr.mxu1 %v147_v57  ;;  %700 = vmatpush3.msra.mxu0 %v99_v58  ;;  %v172_v25 = vld [vmem:[#allocation4 + $0x250] sm:$0xff]  ;;  %v171_v29 = vld [vmem:[#allocation4 + $0x248] sm:$0xff]  ;;  %v186_v30 = vld [vmem:[#allocation4 + $0x2c0] sm:$0xff] }
  0x3c   :  { %756 = vmatpush3.msra.mxu1 %v131_v59  ;;  %701 = vmatprep.subr.mxu0 %v114_v60  ;;  %v71_v31 = vld [vmem:[#allocation2 + $0xe8] sm:$0xff]  ;;  %v73_v32 = vld [vmem:[#allocation2 + $0xf8] sm:$0xff]  ;;  %v170_v33 = vld [vmem:[#allocation4 + $0x240] sm:$0xff] }
  0x3d   :  { %757 = vmatprep.subr.mxu1 %v146_v61  ;;  %702 = vmatpush3.msra.mxu0 %v98_v62  ;;  %v70_v34 = vld [vmem:[#allocation2 + $0xe0] sm:$0xff]  ;;  %v72_v35 = vld [vmem:[#allocation2 + $0xf0] sm:$0xff]  ;;  %v185_v36 = vld [vmem:[#allocation4 + $0x2b8] sm:$0xff] }
  0x3e   :  { %292 = vmatprep.mubr.f32.mxu0 %v43_v63  ;;  %758 = vmatpush3.msra.mxu1 %v130_v0  ;;  %v169_v37 = vld [vmem:[#allocation4 + $0x238] sm:$0xff]  ;;  %v184_v38 = vld [vmem:[#allocation4 + $0x2b0] sm:$0xff]  ;;  %v78_v39 = vld [vmem:[#allocation2 + $0x120] sm:$0xff] }
  0x3f   :  { %397 = vmatprep.mubr.f32.mxu1 %v45_v1  ;;  %293 = vmatmul.mubr.f32.vlgmr.msra.gmra.mxu0 %v42_v2  ;;  %v80_v40 = vld [vmem:[#allocation2 + $0x130] sm:$0xff]  ;;  %v77_v42 = vld [vmem:[#allocation2 + $0x118] sm:$0xff]  ;;  %v79_v43 = vld [vmem:[#allocation2 + $0x128] sm:$0xff] }
  0x40   :  { %398 = vmatmul.mubr.f32.vlgmr.msra.gmra.mxu1 %v44_v3  ;;  %783 = vmatprep.subr.mxu0 %v193_v4  ;;  %v168_v41 = vld [vmem:[#allocation4 + $0x230] sm:$0xff]  ;;  %v183_v44 = vld [vmem:[#allocation4 + $0x2a8] sm:$0xff]  ;;  %v182_v46 = vld [vmem:[#allocation4 + $0x2a0] sm:$0xff] }
  0x41   :  { %865 = vmatprep.subr.mxu1 %v193_v4  ;;  %784 = vmatpush3.msra.mxu0 %v177_v5  ;;  %v167_v45 = vld [vmem:[#allocation4 + $0x228] sm:$0xff]  ;;  %v85_v47 = vld [vmem:[#allocation2 + $0x158] sm:$0xff]  ;;  %v166_v49 = vld [vmem:[#allocation4 + $0x220] sm:$0xff] }
  0x42   :  { %881 = vmatpush3.msra.mxu1 %v177_v5  ;;  %785 = vmatprep.subr.mxu0 %v192_v6  ;;  %v87_v48 = vld [vmem:[#allocation2 + $0x168] sm:$0xff]  ;;  %v84_v50 = vld [vmem:[#allocation2 + $0x150] sm:$0xff]  ;;  %v86_v51 = vld [vmem:[#allocation2 + $0x160] sm:$0xff] }
  0x43   :  { %866 = vmatprep.subr.mxu1 %v192_v6  ;;  %297 = vmatprep.mubr.f32.mxu0 %v50_v7  ;;  %v181_v52 = vld [vmem:[#allocation4 + $0x298] sm:$0xff]  ;;  %v180_v54 = vld [vmem:[#allocation4 + $0x290] sm:$0xff]  ;;  %v94_v56 = vld [vmem:[#allocation2 + $0x1a0] sm:$0xff] }
  0x44   :  { %402 = vmatprep.mubr.f32.mxu1 %v52_v8  ;;  %786 = vmatpush3.msra.mxu0 %v176_v9  ;;  %v165_v53 = vld [vmem:[#allocation4 + $0x218] sm:$0xff]  ;;  %v92_v55 = vld [vmem:[#allocation2 + $0x190] sm:$0xff]  ;;  %v91_v58 = vld [vmem:[#allocation2 + $0x188] sm:$0xff] }
  0x45   :  { %882 = vmatpush3.msra.mxu1 %v176_v9  ;;  %298 = vmatmul.mubr.f32.gmra.mxu0 %v49_v10  ;;  %v164_v57 = vld [vmem:[#allocation4 + $0x210] sm:$0xff]  ;;  %v93_v59 = vld [vmem:[#allocation2 + $0x198] sm:$0xff]  ;;  %v179_v60 = vld [vmem:[#allocation4 + $0x288] sm:$0xff] }
  0x46   :  { %403 = vmatmul.mubr.f32.gmra.mxu1 %v51_v11  ;;  %787 = vmatprep.subr.mxu0 %v191_v12  ;;  %v163_v61 = vld [vmem:[#allocation4 + $0x208] sm:$0xff]  ;;  %v178_v62 = vld [vmem:[#allocation4 + $0x280] sm:$0xff]  ;;  %v89_v1 = vld [vmem:[#allocation2 + $0x178] sm:$0xff] }
  0x47   :  { %867 = vmatprep.subr.mxu1 %v191_v12  ;;  %788 = vmatpush3.msra.mxu0 %v175_v13  ;;  %v162_v63 = vld [vmem:[#allocation4 + $0x200] sm:$0xff]  ;;  %v47_v0 = vld [vmem:[#allocation2 + $0x28] sm:$0xff]  ;;  %v88_v3 = vld [vmem:[#allocation2 + $0x170] sm:$0xff] }
  0x48   :  { %883 = vmatpush3.msra.mxu1 %v175_v13  ;;  %789 = vmatprep.subr.mxu0 %v190_v14  ;;  %v46_v2 = vld [vmem:[#allocation2 + $0x20] sm:$0xff]  ;;  %v96_v5 = vld [vmem:[#allocation2 + $0x1b0] sm:$0xff]  ;;  %v195_v6 = vld [vmem:[#allocation4 + $0x308] sm:$0xff] }
  0x49   :  { %868 = vmatprep.subr.mxu1 %v190_v14  ;;  %302 = vmatprep.mubr.f32.mxu0 %v57_v15  ;;  %v54_v4 = vld [vmem:[#allocation2 + $0x60] sm:$0xff]  ;;  %v53_v7 = vld [vmem:[#allocation2 + $0x58] sm:$0xff]  ;;  %v95_v8 = vld [vmem:[#allocation2 + $0x1a8] sm:$0xff] }
  0x4a   :  { %407 = vmatprep.mubr.f32.mxu1 %v59_v16  ;;  %790 = vmatpush3.msra.mxu0 %v174_v17  ;;  %v194_v9 = vld [vmem:[#allocation4 + $0x300] sm:$0xff]  ;;  %v61_v10 = vld [vmem:[#allocation2 + $0x98] sm:$0xff]  ;;  %v48_v11 = vld [vmem:[#allocation2 + $0x30] sm:$0xff] }
  0x4b   :  { %884 = vmatpush3.msra.mxu1 %v174_v17  ;;  %303 = vmatmul.mubr.f32.gmra.mxu0 %v56_v18  ;;  %v60_v12 = vld [vmem:[#allocation2 + $0x90] sm:$0xff]  ;;  %v55_v13 = vld [vmem:[#allocation2 + $0x68] sm:$0xff]  ;;  %v62_v15 = vld [vmem:[#allocation2 + $0xa0] sm:$0xff] }
  0x4c   :  { %408 = vmatmul.mubr.f32.gmra.mxu1 %v58_v19  ;;  %791 = vmatprep.subr.mxu0 %v189_v20  ;;  %v68_v14 = vld [vmem:[#allocation2 + $0xd0] sm:$0xff]  ;;  %v67_v16 = vld [vmem:[#allocation2 + $0xc8] sm:$0xff]  ;;  %v69_v17 = vld [vmem:[#allocation2 + $0xd8] sm:$0xff] }
  0x4d   :  { %869 = vmatprep.subr.mxu1 %v189_v20  ;;  %792 = vmatpush3.msra.mxu0 %v173_v21  ;;  %v75_v18 = vld [vmem:[#allocation2 + $0x108] sm:$0xff]  ;;  %v76_v19 = vld [vmem:[#allocation2 + $0x110] sm:$0xff]  ;;  %v74_v20 = vld [vmem:[#allocation2 + $0x100] sm:$0xff] }
  0x4e   :  { %885 = vmatpush3.msra.mxu1 %v173_v21  ;;  %793 = vmatprep.subr.mxu0 %v188_v22  ;;  %v83_v21 = vld [vmem:[#allocation2 + $0x148] sm:$0xff] }
  0x4f   :  { %870 = vmatprep.subr.mxu1 %v188_v22  ;;  %307 = vmatprep.mubr.f32.mxu0 %v64_v23  ;;  %v82_v22 = vld [vmem:[#allocation2 + $0x140] sm:$0xff] }
  0x50   :  { %412 = vmatprep.mubr.f32.mxu1 %v66_v24  ;;  %794 = vmatpush3.msra.mxu0 %v172_v25  ;;  %v90_v23 = vld [vmem:[#allocation2 + $0x180] sm:$0xff]  ;;  %v81_v24 = vld [vmem:[#allocation2 + $0x138] sm:$0xff] }
  0x51   :  { %886 = vmatpush3.msra.mxu1 %v172_v25  ;;  %308 = vmatmul.mubr.f32.gmra.mxu0 %v63_v26  ;;  %v97_v25 = vld [vmem:[#allocation2 + $0x1b8] sm:$0xff] }
  0x52   :  { %413 = vmatmul.mubr.f32.gmra.mxu1 %v65_v27  ;;  %795 = vmatprep.subr.mxu0 %v187_v28 }
  0x53   :  { %871 = vmatprep.subr.mxu1 %v187_v28  ;;  %796 = vmatpush3.msra.mxu0 %v171_v29 }
  0x54   :  { %887 = vmatpush3.msra.mxu1 %v171_v29  ;;  %797 = vmatprep.subr.mxu0 %v186_v30 }
  0x55   :  { %872 = vmatprep.subr.mxu1 %v186_v30  ;;  %312 = vmatprep.mubr.f32.mxu0 %v71_v31 }
  0x56   :  { %417 = vmatprep.mubr.f32.mxu1 %v73_v32  ;;  %798 = vmatpush3.msra.mxu0 %v170_v33 }
  0x57   :  { %888 = vmatpush3.msra.mxu1 %v170_v33  ;;  %313 = vmatmul.mubr.f32.gmra.mxu0 %v70_v34 }
  0x58   :  { %418 = vmatmul.mubr.f32.gmra.mxu1 %v72_v35  ;;  %799 = vmatprep.subr.mxu0 %v185_v36 }
  0x59   :  { %873 = vmatprep.subr.mxu1 %v185_v36  ;;  %800 = vmatpush3.msra.mxu0 %v169_v37 }
  0x5a   :  { %889 = vmatpush3.msra.mxu1 %v169_v37  ;;  %801 = vmatprep.subr.mxu0 %v184_v38 }
  0x5b   :  { %874 = vmatprep.subr.mxu1 %v184_v38  ;;  %317 = vmatprep.mubr.f32.mxu0 %v78_v39 }
  0x5c   :  { %422 = vmatprep.mubr.f32.mxu1 %v80_v40  ;;  %802 = vmatpush3.msra.mxu0 %v168_v41 }
  0x5d   :  { %890 = vmatpush3.msra.mxu1 %v168_v41  ;;  %318 = vmatmul.mubr.f32.gmra.mxu0 %v77_v42 }
  0x5e   :  { %423 = vmatmul.mubr.f32.gmra.mxu1 %v79_v43  ;;  %803 = vmatprep.subr.mxu0 %v183_v44 }
  0x5f   :  { %875 = vmatprep.subr.mxu1 %v183_v44  ;;  %804 = vmatpush3.msra.mxu0 %v167_v45 }
  0x60   :  { %891 = vmatpush3.msra.mxu1 %v167_v45  ;;  %805 = vmatprep.subr.mxu0 %v182_v46 }
  0x61   :  { %876 = vmatprep.subr.mxu1 %v182_v46  ;;  %322 = vmatprep.mubr.f32.mxu0 %v85_v47 }
  0x62   :  { %427 = vmatprep.mubr.f32.mxu1 %v87_v48  ;;  %806 = vmatpush3.msra.mxu0 %v166_v49 }
  0x63   :  { %892 = vmatpush3.msra.mxu1 %v166_v49  ;;  %323 = vmatmul.mubr.f32.gmra.mxu0 %v84_v50 }
  0x64   :  { %428 = vmatmul.mubr.f32.gmra.mxu1 %v86_v51  ;;  %807 = vmatprep.subr.mxu0 %v181_v52 }
  0x65   :  { %877 = vmatprep.subr.mxu1 %v181_v52  ;;  %808 = vmatpush3.msra.mxu0 %v165_v53 }
  0x66   :  { %893 = vmatpush3.msra.mxu1 %v165_v53  ;;  %809 = vmatprep.subr.mxu0 %v180_v54 }
  0x67   :  { %878 = vmatprep.subr.mxu1 %v180_v54  ;;  %327 = vmatprep.mubr.f32.mxu0 %v92_v55 }
  0x68   :  { %432 = vmatprep.mubr.f32.mxu1 %v94_v56  ;;  %810 = vmatpush3.msra.mxu0 %v164_v57 }
  0x69   :  { %894 = vmatpush3.msra.mxu1 %v164_v57  ;;  %328 = vmatmul.mubr.f32.gmra.mxu0 %v91_v58 }
  0x6a   :  { %433 = vmatmul.mubr.f32.gmra.mxu1 %v93_v59  ;;  %811 = vmatprep.subr.mxu0 %v179_v60 }
  0x6b   :  { %879 = vmatprep.subr.mxu1 %v179_v60  ;;  %812 = vmatpush3.msra.mxu0 %v163_v61  ;;  %v662_v60 = vld [vmem:[%s1022_s2] ss:$0 sm:$0xff] }
  0x6c   :  { %895 = vmatpush3.msra.mxu1 %v163_v61  ;;  %813 = vmatprep.subr.mxu0 %v178_v62 }
  0x6d   :  { %880 = vmatprep.subr.mxu1 %v178_v62  ;;  %814 = vmatpush3.msra.mxu0 %v162_v63 }
  0x6e   :  { %896 = vmatpush3.msra.mxu1 %v162_v63  ;;  %502 = vmatprep.mubr.f32.mxu0 %v47_v0 }
  0x6f   :  { %532 = vmatprep.mubr.f32.mxu1 %v89_v1  ;;  %503 = vmatmul.mubr.f32.vlgmr.msra.gmra.mxu0 %v46_v2 }
  0x70   :  { %533 = vmatmul.mubr.f32.vlgmr.msra.gmra.mxu1 %v88_v3  ;;  %507 = vmatprep.mubr.f32.mxu0 %v54_v4 }
  0x71   :  { %537 = vmatprep.mubr.f32.mxu1 %v96_v5  ;;  %849 = vmatprep.subr.mxu1 %v195_v6 }
  0x72   :  { %850 = vmatpush3.msra.mxu1 %v195_v6 }
  0x73   :  { %508 = vmatmul.mubr.f32.gmra.mxu0 %v53_v7  ;;  %851 = vmatprep.subr.mxu1 %v194_v9 }
  0x74   :  { %538 = vmatmul.mubr.f32.gmra.mxu1 %v95_v8  ;;  %512 = vmatprep.mubr.f32.mxu0 %v61_v10 }
  0x75   :  { %852 = vmatpush3.msra.mxu1 %v194_v9  ;;  %853 = vmatprep.mubr.msk.f32.mxu1 %vm203_vm0, %v48_v11 }
  0x77   :  { %513 = vmatmul.mubr.f32.gmra.mxu0 %v60_v12 }
  0x78   :  { %854 = vmatmul.mubr.msk.f32.vlgmr.msra.gmra.mxu1 %vm203_vm0, %v55_v13  ;;  %517 = vmatprep.mubr.f32.mxu0 %v68_v14 }
  0x79   :  { %856 = vmatprep.mubr.msk.f32.mxu1 %vm203_vm0, %v62_v15 }
  0x7b   :  { %518 = vmatmul.mubr.f32.gmra.mxu0 %v67_v16 }
  0x7c   :  { %857 = vmatmul.mubr.msk.f32.gmra.mxu1 %vm203_vm0, %v69_v17  ;;  %522 = vmatprep.mubr.f32.mxu0 %v75_v18 }
  0x7d   :  { %859 = vmatprep.mubr.msk.f32.mxu1 %vm203_vm0, %v76_v19 }
  0x7f   :  { %523 = vmatmul.mubr.f32.gmra.mxu0 %v74_v20 }
  0x80   :  { %860 = vmatmul.mubr.msk.f32.gmra.mxu1 %vm203_vm0, %v83_v21  ;;  %527 = vmatprep.mubr.f32.mxu0 %v82_v22 }
  0x81   :  { %862 = vmatprep.mubr.msk.f32.mxu1 %vm203_vm0, %v90_v23 }
  0x83   :  { %528 = vmatmul.mubr.f32.gmra.mxu0 %v81_v24 }
  0x84   :  { %863 = vmatmul.mubr.msk.f32.gmra.mxu1 %vm203_vm0, %v97_v25 }
  0xff   :  { %v703_v26 = vpop.f32.mrf.mxu0 }
 0x100   :  { %v759_v27 = vpop.f32.mrf.mxu1 }
 0x101   :  { %v704_v28 = vpop.f32.mrf.mxu0 }
 0x102   :  { %v760_v29 = vpop.f32.mrf.mxu1  ;;  %v705_v58 = vadd.f32 %v704_v28, %v703_v26 }
 0x103   :  { %v761_v3 = vadd.f32 %v760_v29, %v759_v27 }
 0x104   :  { %v295_v2 = vadd.f32 %v705_v58, %v662_v60 }
 0x105   :  { %v706_v30 = vpop.f32.mrf.mxu0 }
 0x106   :  { %v762_v31 = vpop.f32.mrf.mxu1  ;;  %v400_v14 = vadd.f32 %v761_v3, %v295_v2 }
 0x107   :  { %v707_v32 = vpop.f32.mrf.mxu0 }
 0x108   :  { %v763_v33 = vpop.f32.mrf.mxu1  ;;  %v708_v59 = vadd.f32 %v707_v32, %v706_v30 }
 0x109   :  { %v764_v5 = vadd.f32 %v763_v33, %v762_v31 }
 0x10a   :  { %v300_v4 = vadd.f32 %v708_v59, %v662_v60 }
 0x10b   :  { %v709_v34 = vpop.f32.mrf.mxu0 }
 0x10c   :  { %v765_v35 = vpop.f32.mrf.mxu1  ;;  %v405_v15 = vadd.f32 %v764_v5, %v300_v4 }
 0x10d   :  { %v710_v36 = vpop.f32.mrf.mxu0 }
 0x10e   :  { %v766_v37 = vpop.f32.mrf.mxu1  ;;  %v711_v63 = vadd.f32 %v710_v36, %v709_v34 }
 0x10f   :  { %v767_v11 = vadd.f32 %v766_v37, %v765_v35 }
 0x110   :  { %v305_v10 = vadd.f32 %v711_v63, %v662_v60 }
 0x111   :  { %v712_v38 = vpop.f32.mrf.mxu0 }
 0x112   :  { %v768_v39 = vpop.f32.mrf.mxu1  ;;  %v410_v24 = vadd.f32 %v767_v11, %v305_v10 }
 0x113   :  { %v713_v40 = vpop.f32.mrf.mxu0 }
 0x114   :  { %v769_v41 = vpop.f32.mrf.mxu1  ;;  %v714_v8 = vadd.f32 %v713_v40, %v712_v38 }
 0x115   :  { %v770_v17 = vadd.f32 %v769_v41, %v768_v39 }
 0x116   :  { %v310_v20 = vadd.f32 %v714_v8, %v662_v60 }
 0x117   :  { %v715_v42 = vpop.f32.mrf.mxu0 }
 0x118   :  { %v771_v43 = vpop.f32.mrf.mxu1  ;;  %v415_v34 = vadd.f32 %v770_v17, %v310_v20 }
 0x119   :  { %v716_v44 = vpop.f32.mrf.mxu0 }
 0x11a   :  { %v772_v45 = vpop.f32.mrf.mxu1  ;;  %v717_v25 = vadd.f32 %v716_v44, %v715_v42 }
 0x11b   :  { %v773_v39 = vadd.f32 %v772_v45, %v771_v43 }
 0x11c   :  { %v315_v38 = vadd.f32 %v717_v25, %v662_v60 }
 0x11d   :  { %v718_v46 = vpop.f32.mrf.mxu0 }
 0x11e   :  { %v987_v47 = vpop.f32.mrf.mxu1  ;;  %v420_v63 = vadd.f32 %v773_v39, %v315_v38 }
 0x11f   :  { %v719_v48 = vpop.f32.mrf.mxu0 }
 0x120   :  { %v989_v49 = vpop.f32.mrf.mxu1  ;;  %v720_v40 = vadd.f32 %v719_v48, %v718_v46 }
 0x121   :  { %v776_v43 = vadd.f32 %v989_v49, %v987_v47 }
 0x123   :  { %v721_v50 = vpop.f32.mrf.mxu0 }
 0x124   :  { %v777_v51 = vpop.f32.mrf.mxu1 }
 0x125   :  { %v722_v52 = vpop.f32.mrf.mxu0 }
 0x126   :  { %v778_v53 = vpop.f32.mrf.mxu1  ;;  %v723_v28 = vadd.f32 %v722_v52, %v721_v50 }
 0x127   :  { %v779_v41 = vadd.f32 %v778_v53, %v777_v51 }
 0x128   :  { %v325_v50 = vadd.f32 %v723_v28, %v662_v60 }
 0x129   :  { %v724_v54 = vpop.f32.mrf.mxu0 }
 0x12a   :  { %v780_v55 = vpop.f32.mrf.mxu1  ;;  %v430_v48 = vadd.f32 %v779_v41, %v325_v50 }
 0x12b   :  { %v725_v56 = vpop.f32.mrf.mxu0 }
 0x12c   :  { %v781_v57 = vpop.f32.mrf.mxu1  ;;  %v726_v21 = vadd.f32 %v725_v56, %v724_v54 }
 0x12d   :  { %v782_v36 = vadd.f32 %v781_v57, %v780_v55 }
 0x12e   :  { %v330_v35 = vadd.f32 %v726_v21, %v662_v60 }
 0x12f   :  { %v815_v61 = vpop.f32.mrf.mxu0 }
 0x130   :  { %v833_v62 = vpop.f32.mrf.mxu1  ;;  %v435_v58 = vadd.f32 %v782_v36, %v330_v35 }
 0x131   :  { %v816_v0 = vpop.f32.mrf.mxu0 }
 0x132   :  { %v834_v1 = vpop.f32.mrf.mxu1  ;;  %v817_v9 = vadd.f32 %v816_v0, %v815_v61  ;;  %v320_v0 = vadd.f32 %v720_v40, %v662_v60 }
 0x133   :  { %v818_v6 = vpop.f32.mrf.mxu0  ;;  %v835_v59 = vadd.f32 %v834_v1, %v833_v62 }
 0x134   :  { %v836_v7 = vpop.f32.mrf.mxu1  ;;  %v505_v23 = vadd.f32 %v817_v9, %v400_v14 }
 0x135   :  { %v819_v12 = vpop.f32.mrf.mxu0  ;;  %v535_v5 = vadd.f32 %v835_v59, %v430_v48 }
 0x136   :  { %v837_v13 = vpop.f32.mrf.mxu1  ;;  %v820_v16 = vadd.f32 %v819_v12, %v818_v6 }
 0x137   :  { %v821_v18 = vpop.f32.mrf.mxu0  ;;  %v838_v52 = vadd.f32 %v837_v13, %v836_v7  ;;  %v425_v7 = vadd.f32 %v776_v43, %v320_v0 }
 0x138   :  { %v855_v19 = vpop.f32.mrf.mxu1  ;;  %v510_v22 = vadd.f32 %v820_v16, %v405_v15 }
 0x139   :  { %v822_v26 = vpop.f32.mrf.mxu0  ;;  %v540_v2 = vadd.f32 %v838_v52, %v435_v58 }
 0x13a   :  { %v609_v27 = vpop.f32.mrf.mxu1  ;;  %v615_v29 = vadd.f32 %v855_v19, %v510_v22  ;;  %v823_v30 = vadd.f32 %v822_v26, %v821_v18 }
 0x13b   :  { %v610_v31 = vadd.f32 %v609_v27, %v505_v23  ;;  %v824_v32 = vpop.f32.mrf.mxu0 }
 0x13c   :  { %v858_v33 = vpop.f32.mrf.mxu1  ;;  %649 = vst [vmem:[%s1023_s3 + $0x8] sm:$0xff] %v615_v29  ;;  %v515_v37 = vadd.f32 %v823_v30, %v410_v24 }
 0x13d   :  { %648 = vst [vmem:[%s1023_s3] sm:$0xff] %v610_v31  ;;  %v825_v42 = vpop.f32.mrf.mxu0 }
 0x13e   :  { %v619_v44 = vpop.f32.mrf.mxu1  ;;  %v826_v54 = vadd.f32 %v825_v42, %v824_v32 }
 0x13f   :  { %v620_v56 = vadd.f32 %v619_v44, %v515_v37  ;;  %v827_v55 = vpop.f32.mrf.mxu0 }
 0x140   :  { %v861_v57 = vpop.f32.mrf.mxu1  ;;  %v520_v61 = vadd.f32 %v826_v54, %v415_v34 }
 0x141   :  { %650 = vst [vmem:[%s1023_s3 + $0x10] sm:$0xff] %v620_v56  ;;  %v828_v45 = vpop.f32.mrf.mxu0 }
 0x142   :  { %v629_v46 = vpop.f32.mrf.mxu1  ;;  %v625_v51 = vadd.f32 %v858_v33, %v520_v61  ;;  %v829_v53 = vadd.f32 %v828_v45, %v827_v55 }
 0x143   :  { %v830_v3 = vpop.f32.mrf.mxu0 }
 0x144   :  { %v864_v4 = vpop.f32.mrf.mxu1  ;;  %651 = vst [vmem:[%s1023_s3 + $0x18] sm:$0xff] %v625_v51  ;;  %v525_v62 = vadd.f32 %v829_v53, %v420_v63 }
 0x145   :  { %v645_v1 = vadd.f32 %v864_v4, %v540_v2  ;;  %v831_v6 = vpop.f32.mrf.mxu0 }
 0x146   :  { %v639_v60 = vpop.f32.mrf.mxu1  ;;  %v630_v8 = vadd.f32 %v629_v46, %v525_v62  ;;  %v832_v47 = vadd.f32 %v831_v6, %v830_v3 }
 0x147   :  { %655 = vst [vmem:[%s1023_s3 + $0x38] sm:$0xff] %v645_v1  ;;  %v640_v49 = vadd.f32 %v639_v60, %v535_v5 }
 0x148   :  { %652 = vst [vmem:[%s1023_s3 + $0x20] sm:$0xff] %v630_v8  ;;  %v530_v9 = vadd.f32 %v832_v47, %v425_v7 }
 0x149   :  { %654 = vst [vmem:[%s1023_s3 + $0x30] sm:$0xff] %v640_v49 }
 0x14a   :  { %v635_v10 = vadd.f32 %v861_v57, %v530_v9 }
 0x14c   :  { %653 = vst [vmem:[%s1023_s3 + $0x28] sm:$0xff] %v635_v10 }
 0x14d   :  { %660 = vsyncpa [#allocation3], 1 }
 0x14e   :  { %661 = vsyncpa [#allocation5], 1 }

</bundles_post_ra>
